<compile_context>
chip_gen: v7x
topology: tpu7x:2x2x1
jax: 0.10.0
libtpu: 0.0.40
codegen_flags: <defaults>
</compile_context>

<pallas_src>
import functools

import jax
import jax.numpy as jnp
from jax.experimental import pallas as pl
from jax.experimental.pallas import tpu as pltpu

_LANE = 128
_MIN_BLOCK_BYTES = 512 * 1024     # below this, per-step overhead dominates
_MIN_GRID_STEPS = 4               # >= 2 steps per TensorCore on v7x megacore


def fsmn_kernel(x_ref, wl_ref, wr_ref, out_ref, xpad_ref, *,
                T, lorder, rorder, lstride, rstride):
    """x_ref:    (Bt, T, tD)          input block (input dtype).
       wl_ref:   (lorder, tD)         left (history) taps, f32.
       wr_ref:   (max(rorder,1), tD)  right (lookahead) taps, f32 (dummy if rorder==0).
       out_ref:  (Bt, T, tD)          output block.
       xpad_ref: (Bt, Tp, tD)         zero-haloed scratch in the input dtype."""
    Lpad = (lorder - 1) * lstride
    Rpad = rorder * rstride
    Bt, _, tD = x_ref.shape

    wl = wl_ref[...].astype(jnp.float32)                         # (lorder, tD)

    if Lpad == 0 and Rpad == 0:
        # Degenerate case (lorder == 1, rorder == 0): pure residual scaling.
        out_ref[...] = ((1.0 + wl[0:1, :])[:, None, :]
                        * x_ref[...].astype(jnp.float32)).astype(out_ref.dtype)
        return

    # Zero the small time halos and drop the raw (input-dtype) block into the
    # middle of the scratch.  Halos are re-zeroed every step on purpose: with
    # "parallel" grid axes each core owns its own scratch and is not guaranteed
    # to execute step 0, so a first-step-only guard would be unsafe; the halo
    # is only a handful of rows, so the cost is negligible.
    if Lpad > 0:
        xpad_ref[:, pl.ds(0, Lpad), :] = jnp.zeros((Bt, Lpad, tD), xpad_ref.dtype)
    if Rpad > 0:
        xpad_ref[:, pl.ds(Lpad + T, Rpad), :] = jnp.zeros((Bt, Rpad, tD),
                                                          xpad_ref.dtype)
    xpad_ref[:, pl.ds(Lpad, T), :] = x_ref[...]

    # Residual fused with the last (unshifted) left tap; accumulation in f32.
    center = xpad_ref[:, pl.ds(Lpad, T), :].astype(jnp.float32)
    acc = (1.0 + wl[lorder - 1:lorder, :])[:, None, :] * center

    # Remaining left (causal / history) taps.
    for i in range(lorder - 1):
        tap = xpad_ref[:, pl.ds(i * lstride, T), :].astype(jnp.float32)
        acc = acc + wl[i:i + 1, :][:, None, :] * tap

    # Right (anti-causal / lookahead) taps.
    if rorder > 0:
        wr = wr_ref[...].astype(jnp.float32)                     # (rorder, tD)
        for j in range(rorder):
            off = Lpad + (j + 1) * rstride
            tap = xpad_ref[:, pl.ds(off, T), :].astype(jnp.float32)
            acc = acc + wr[j:j + 1, :][:, None, :] * tap

    out_ref[...] = acc.astype(out_ref.dtype)


def _vmem_capacity_bytes():
    """Physical per-core VMEM, with a conservative (v7x-sized) fallback."""
    try:
        cap = getattr(pltpu.get_tpu_info(), "vmem_capacity_bytes", None)
        if cap:
            return int(cap)
    except Exception:
        pass
    return 64 * 1024 * 1024


def _plan_tiles(B, T, D, itemsize, budget_bytes):
    """Pick (batch_tile, feature_tile).

    Feature tiles are lane-aligned (multiple-of-128) divisors of D when
    D % 128 == 0, otherwise the single full-D block (legal because the block
    then equals the array dim).  Batch tiling uses a cdiv grid, so the batch
    tile does not need to divide B (tail rows are masked on the output write).
    Preference order: block >= _MIN_BLOCK_BYTES, block <= budget, >= 4 grid
    steps (two per v7x TensorCore), then the biggest fitting block.
    """
    if D % _LANE == 0:
        d_cands = [t for t in range(min(D, 4 * _LANE), 0, -_LANE) if D % t == 0]
    else:
        d_cands = [D]

    best_cfg, best_score = None, None
    for td in d_cands:
        row = T * td * itemsize
        for bt in range(1, B + 1):
            blk = bt * row
            if blk > budget_bytes and bt > 1:
                break
            steps = (-(-B // bt)) * (D // td)
            waste = (-(-B // bt)) * bt - B
            score = (min(blk, _MIN_BLOCK_BYTES),     # avoid degenerate tiny blocks
                     blk <= budget_bytes,            # respect the VMEM budget
                     min(steps, _MIN_GRID_STEPS),    # feed the pipeline / both cores
                     blk if blk <= budget_bytes else -blk,
                     -waste)
            if best_score is None or score > best_score:
                best_cfg, best_score = (bt, td), score
    return best_cfg


def fsmn_block(x, w_left, w_right=None, *, lorder, rorder=0, lstride=1,
               rstride=1, batch_tile=None, feature_tile=None):
    """FSMNBlock.forward.  x: (B, T, D).
    w_left[i, d] == conv_left.weight[d, 0, i, 0]  (shape (lorder, D)).
    w_right[j, d] == conv_right.weight[d, 0, j, 0] (shape (rorder, D)) or None.
    Returns (B, T, D) in x.dtype.  batch_tile / feature_tile are test/tuning
    overrides for the automatic plan."""
    B, T, D = x.shape
    rorder = 0 if rorder is None else int(rorder)
    assert lorder >= 1, "FSMNBlock requires lorder >= 1"
    assert w_left.shape == (lorder, D), (w_left.shape, (lorder, D))
    if rorder > 0:
        assert w_right is not None and w_right.shape == (rorder, D)
        w_right = jnp.asarray(w_right, jnp.float32)
    else:
        w_right = jnp.zeros((1, D), jnp.float32)    # dummy operand, never read
    w_left = jnp.asarray(w_left, jnp.float32)
    Rw = w_right.shape[0]

    itemsize = jnp.dtype(x.dtype).itemsize
    vmem_cap = _vmem_capacity_bytes()
    big_vmem = vmem_cap >= 100 * 1024 * 1024        # v5e / v6e (128 MiB class)
    budget = (6 << 20) if big_vmem else (5 << 19)   # ~6 MiB vs ~2.5 MiB per block
    base_limit = (64 << 20) if big_vmem else (44 << 20)

    Bt, tD = _plan_tiles(B, T, D, itemsize, budget)
    if feature_tile is not None:
        tD = int(feature_tile)
    if batch_tile is not None:
        Bt = int(batch_tile)
    assert 1 <= Bt and D % tD == 0 and (tD % _LANE == 0 or tD == D)
    num_d_tiles = D // tD

    Lpad = (lorder - 1) * lstride
    Rpad = rorder * rstride
    Tp = T + Lpad + Rpad
    # TODO(synk): for extreme T where even a (1, T, 128) block overflows the VMEM
    # budget, add a time-tile grid axis with Lpad/Rpad halos fetched via manual
    # make_async_copy from an ANY-space x (matters mostly on v7x's 64 MiB VMEM).

    blk_bytes = Bt * T * tD * itemsize
    scratch_bytes = Bt * Tp * tD * itemsize
    w_bytes = 4 * (lorder + Rw) * tD * 4
    needed = 4 * blk_bytes + scratch_bytes + w_bytes    # 2x-buffered in/out + scratch
    vmem_limit = min(max(base_limit, needed + (2 << 20)), vmem_cap - (4 << 20))
    vmem_limit = max(vmem_limit, 16 << 20)

    kernel = functools.partial(fsmn_kernel, T=T, lorder=lorder, rorder=rorder,
                               lstride=lstride, rstride=rstride)

    return pl.pallas_call(
        kernel,
        out_shape=jax.ShapeDtypeStruct((B, T, D), x.dtype),
        grid=(pl.cdiv(B, Bt), num_d_tiles),
        in_specs=[
            pl.BlockSpec((Bt, T, tD), lambda b, d: (b, 0, d)),     # x
            pl.BlockSpec((lorder, tD), lambda b, d: (0, d)),       # left taps
            pl.BlockSpec((Rw, tD), lambda b, d: (0, d)),           # right taps
        ],
        out_specs=pl.BlockSpec((Bt, T, tD), lambda b, d: (b, 0, d)),
        scratch_shapes=[pltpu.VMEM((Bt, Tp, tD), x.dtype)],
        compiler_params=pltpu.CompilerParams(
            dimension_semantics=("parallel", "parallel"),
            vmem_limit_bytes=int(vmem_limit)),
    )(x, w_left, w_right)


def fsmn_ref(x, w_left, w_right=None, *, lorder, rorder=0, lstride=1, rstride=1):
    """Pure-JAX reference mirroring the PyTorch forward."""
    B, T, D = x.shape
    Lpad = (lorder - 1) * lstride
    Rpad = rorder * rstride
    xp = jnp.pad(x.astype(jnp.float32), ((0, 0), (Lpad, Rpad), (0, 0)))
    out = x.astype(jnp.float32)
    for i in range(lorder):
        s = i * lstride
        out = out + w_left[i][None, None, :].astype(jnp.float32) * xp[:, s:s + T, :]
    for j in range(rorder):
        s = Lpad + (j + 1) * rstride
        out = out + w_right[j][None, None, :].astype(jnp.float32) * xp[:, s:s + T, :]
    return out.astype(x.dtype)


if __name__ == "__main__":
    def _run_case(B, T, D, lorder, rorder, lstride, rstride, salt,
                  dtype=jnp.float32, batch_tile=None, tol=1e-5):
        key = jax.random.fold_in(jax.random.PRNGKey(0), salt)
        kx, kl, kr = jax.random.split(key, 3)
        x = jax.random.normal(kx, (B, T, D), dtype=jnp.float32).astype(dtype)
        w_left = 0.1 * jax.random.normal(kl, (lorder, D), dtype=jnp.float32)
        w_right = (0.1 * jax.random.normal(kr, (rorder, D), dtype=jnp.float32)
                   if rorder > 0 else None)

        out = fsmn_block(x, w_left, w_right, lorder=lorder, rorder=rorder,
                         lstride=lstride, rstride=rstride, batch_tile=batch_tile)
        out = jax.block_until_ready(out)
        ref = fsmn_ref(x, w_left, w_right, lorder=lorder, rorder=rorder,
                       lstride=lstride, rstride=rstride)
        assert out.shape == (B, T, D) and out.dtype == x.dtype
        outf, reff = out.astype(jnp.float32), ref.astype(jnp.float32)
        assert jnp.allclose(outf, reff, atol=tol, rtol=tol), \
            f"mismatch: max abs err {jnp.max(jnp.abs(outf - reff))}"

    # Typical FSMN block: lane-aligned features, history + lookahead taps.
    _run_case(B=2, T=16, D=128, lorder=3, rorder=2, lstride=1, rstride=1, salt=0)
    # Non-lane-aligned feature dim (full-D block, no HBM pad) + dilation strides.
    _run_case(B=3, T=24, D=48, lorder=4, rorder=2, lstride=2, rstride=2, salt=1)
    # Causal-only block (conv_right is None).
    _run_case(B=2, T=16, D=128, lorder=3, rorder=0, lstride=1, rstride=1, salt=2)
    # Feature tiling (D // tD > 1) with batch folding.
    _run_case(B=4, T=32, D=1024, lorder=3, rorder=2, lstride=1, rstride=1, salt=3)
    # Non-divisor batch tiling: cdiv grid with a masked tail block.
    _run_case(B=3, T=32, D=128, lorder=3, rorder=2, lstride=1, rstride=1, salt=4,
              batch_tile=2)
    # bf16 input: haloed scratch stays bf16, accumulation in f32.
    _run_case(B=2, T=64, D=128, lorder=2, rorder=1, lstride=16, rstride=16,
              salt=5, dtype=jnp.bfloat16, tol=5e-2)

    print("KERNEL_OK")
</pallas_src>

<mosaic_0001>
module attributes {stable_mosaic.version = 11 : i64} {
  func.func @fsmn_kernel(%arg0: i32, %arg1: i32, %arg2: memref<2x16x128xf32, #tpu.memory_space<vmem>>, %arg3: memref<3x128xf32, #tpu.memory_space<vmem>>, %arg4: memref<2x128xf32, #tpu.memory_space<vmem>>, %arg5: memref<2x16x128xf32, #tpu.memory_space<vmem>>, %arg6: memref<2x20x128xf32, #tpu.memory_space<vmem>>) attributes {dimension_semantics = [#tpu.dimension_semantics<parallel>, #tpu.dimension_semantics<parallel>], iteration_bounds = array<i64: 1, 1>, scalar_prefetch = 0 : i64, scratch_operands = 1 : i64, tpu.core_type = #tpu.core_type<tc>, window_params = [{transform_indices = @transform_0, window_bounds = array<i64: 2, 16, 128>}, {transform_indices = @transform_1, window_bounds = array<i64: 3, 128>}, {transform_indices = @transform_2, window_bounds = array<i64: 2, 128>}, {transform_indices = @transform_3, window_bounds = array<i64: 2, 16, 128>}]} {
    %c0 = arith.constant 0 : index
    %c0_0 = arith.constant 0 : index
    %0 = vector.load %arg3[%c0, %c0_0] : memref<3x128xf32, #tpu.memory_space<vmem>>, vector<3x128xf32>
    %cst = arith.constant 0.000000e+00 : f32
    %1 = vector.broadcast %cst : f32 to vector<2x2x128xf32>
    %c0_1 = arith.constant 0 : index
    %c0_2 = arith.constant 0 : index
    %c0_3 = arith.constant 0 : index
    %2 = vector.load %arg6[%c0_1, %c0_2, %c0_3] : memref<2x20x128xf32, #tpu.memory_space<vmem>>, vector<2x2x128xf32>
    tpu.vector_store %arg6[%c0_1, %c0_2, %c0_3], %1 {strides = array<i32>} : memref<2x20x128xf32, #tpu.memory_space<vmem>>, vector<2x2x128xf32>,
    %cst_4 = arith.constant 0.000000e+00 : f32
    %3 = vector.broadcast %cst_4 : f32 to vector<2x2x128xf32>
    %c0_5 = arith.constant 0 : index
    %c18 = arith.constant 18 : index
    %c0_6 = arith.constant 0 : index
    %4 = vector.load %arg6[%c0_5, %c18, %c0_6] : memref<2x20x128xf32, #tpu.memory_space<vmem>>, vector<2x2x128xf32>
    tpu.vector_store %arg6[%c0_5, %c18, %c0_6], %3 {strides = array<i32>} : memref<2x20x128xf32, #tpu.memory_space<vmem>>, vector<2x2x128xf32>,
    %c0_7 = arith.constant 0 : index
    %c0_8 = arith.constant 0 : index
    %c0_9 = arith.constant 0 : index
    %5 = vector.load %arg2[%c0_7, %c0_8, %c0_9] : memref<2x16x128xf32, #tpu.memory_space<vmem>>, vector<2x16x128xf32>
    %c0_10 = arith.constant 0 : index
    %c2 = arith.constant 2 : index
    %c0_11 = arith.constant 0 : index
    %6 = vector.load %arg6[%c0_10, %c2, %c0_11] : memref<2x20x128xf32, #tpu.memory_space<vmem>>, vector<2x16x128xf32>
    tpu.vector_store %arg6[%c0_10, %c2, %c0_11], %5 {strides = array<i32>} : memref<2x20x128xf32, #tpu.memory_space<vmem>>, vector<2x16x128xf32>,
    %c0_12 = arith.constant 0 : index
    %c2_13 = arith.constant 2 : index
    %c0_14 = arith.constant 0 : index
    %7 = vector.load %arg6[%c0_12, %c2_13, %c0_14] : memref<2x20x128xf32, #tpu.memory_space<vmem>>, vector<2x16x128xf32>
    %8 = vector.extract_strided_slice %0 {offsets = [2, 0], sizes = [1, 128], strides = [1, 1]} : vector<3x128xf32> to vector<1x128xf32>
    %cst_15 = arith.constant 1.000000e+00 : f32
    %9 = vector.broadcast %cst_15 : f32 to vector<1x128xf32>
    %10 = arith.addf %9, %8 : vector<1x128xf32>
    %11 = vector.shape_cast %10 : vector<1x128xf32> to vector<1x1x128xf32>
    %12 = vector.broadcast %11 : vector<1x1x128xf32> to vector<2x16x128xf32>
    %13 = arith.mulf %12, %7 : vector<2x16x128xf32>
    %c0_16 = arith.constant 0 : index
    %c0_17 = arith.constant 0 : index
    %c0_18 = arith.constant 0 : index
    %14 = vector.load %arg6[%c0_16, %c0_17, %c0_18] : memref<2x20x128xf32, #tpu.memory_space<vmem>>, vector<2x16x128xf32>
    %15 = vector.extract_strided_slice %0 {offsets = [0, 0], sizes = [1, 128], strides = [1, 1]} : vector<3x128xf32> to vector<1x128xf32>
    %16 = vector.shape_cast %15 : vector<1x128xf32> to vector<1x1x128xf32>
    %17 = vector.broadcast %16 : vector<1x1x128xf32> to vector<2x16x128xf32>
    %18 = arith.mulf %17, %14 : vector<2x16x128xf32>
    %19 = arith.addf %13, %18 : vector<2x16x128xf32>
    %c0_19 = arith.constant 0 : index
    %c1 = arith.constant 1 : index
    %c0_20 = arith.constant 0 : index
    %20 = vector.load %arg6[%c0_19, %c1, %c0_20] : memref<2x20x128xf32, #tpu.memory_space<vmem>>, vector<2x16x128xf32>
    %21 = vector.extract_strided_slice %0 {offsets = [1, 0], sizes = [1, 128], strides = [1, 1]} : vector<3x128xf32> to vector<1x128xf32>
    %22 = vector.shape_cast %21 : vector<1x128xf32> to vector<1x1x128xf32>
    %23 = vector.broadcast %22 : vector<1x1x128xf32> to vector<2x16x128xf32>
    %24 = arith.mulf %23, %20 : vector<2x16x128xf32>
    %25 = arith.addf %19, %24 : vector<2x16x128xf32>
    %c0_21 = arith.constant 0 : index
    %c0_22 = arith.constant 0 : index
    %26 = vector.load %arg4[%c0_21, %c0_22] : memref<2x128xf32, #tpu.memory_space<vmem>>, vector<2x128xf32>
    %c0_23 = arith.constant 0 : index
    %c3 = arith.constant 3 : index
    %c0_24 = arith.constant 0 : index
    %27 = vector.load %arg6[%c0_23, %c3, %c0_24] : memref<2x20x128xf32, #tpu.memory_space<vmem>>, vector<2x16x128xf32>
    %28 = vector.extract_strided_slice %26 {offsets = [0, 0], sizes = [1, 128], strides = [1, 1]} : vector<2x128xf32> to vector<1x128xf32>
    %29 = vector.shape_cast %28 : vector<1x128xf32> to vector<1x1x128xf32>
    %30 = vector.broadcast %29 : vector<1x1x128xf32> to vector<2x16x128xf32>
    %31 = arith.mulf %30, %27 : vector<2x16x128xf32>
    %32 = arith.addf %25, %31 : vector<2x16x128xf32>
    %c0_25 = arith.constant 0 : index
    %c4 = arith.constant 4 : index
    %c0_26 = arith.constant 0 : index
    %33 = vector.load %arg6[%c0_25, %c4, %c0_26] : memref<2x20x128xf32, #tpu.memory_space<vmem>>, vector<2x16x128xf32>
    %34 = vector.extract_strided_slice %26 {offsets = [1, 0], sizes = [1, 128], strides = [1, 1]} : vector<2x128xf32> to vector<1x128xf32>
    %35 = vector.shape_cast %34 : vector<1x128xf32> to vector<1x1x128xf32>
    %36 = vector.broadcast %35 : vector<1x1x128xf32> to vector<2x16x128xf32>
    %37 = arith.mulf %36, %33 : vector<2x16x128xf32>
    %38 = arith.addf %32, %37 : vector<2x16x128xf32>
    %c0_27 = arith.constant 0 : index
    %c0_28 = arith.constant 0 : index
    %c0_29 = arith.constant 0 : index
    %39 = vector.load %arg5[%c0_27, %c0_28, %c0_29] : memref<2x16x128xf32, #tpu.memory_space<vmem>>, vector<2x16x128xf32>
    tpu.vector_store %arg5[%c0_27, %c0_28, %c0_29], %38 {strides = array<i32>} : memref<2x16x128xf32, #tpu.memory_space<vmem>>, vector<2x16x128xf32>,
    return
  }
  func.func @transform_0(%arg0: i32, %arg1: i32) -> (i32, i32, i32) {
    %c0_i32 = arith.constant 0 : i32
    %c0_i32_0 = arith.constant 0 : i32
    return %arg0, %c0_i32, %arg1 : i32, i32, i32
  }
  func.func @transform_1(%arg0: i32, %arg1: i32) -> (i32, i32) {
    %c0_i32 = arith.constant 0 : i32
    %c0_i32_0 = arith.constant 0 : i32
    return %c0_i32, %arg1 : i32, i32
  }
  func.func @transform_2(%arg0: i32, %arg1: i32) -> (i32, i32) {
    %c0_i32 = arith.constant 0 : i32
    %c0_i32_0 = arith.constant 0 : i32
    return %c0_i32, %arg1 : i32, i32
  }
  func.func @transform_3(%arg0: i32, %arg1: i32) -> (i32, i32, i32) {
    %c0_i32 = arith.constant 0 : i32
    %c0_i32_0 = arith.constant 0 : i32
    return %arg0, %c0_i32, %arg1 : i32, i32, i32
  }
}

</mosaic_0001>

<bundles_post_ra>
// kernel: tpu_custom_call.1
= control target key start
LH: loop header
LB: loop body
LE: loop exit
PB: predicated region body
PF: predicated region fallthrough
CT: control target
= control target key end

     0   :  { %8 = vsyncpa [#allocation4], 0  ;;  %s303_s0 = inlined_call_operand.hbm [shape: f32[2,16,128], index: 0, kind: input, shape index: {}]   ;;  %s304_s1 = inlined_call_operand.hbm [shape: f32[3,128], index: 1, kind: input, shape index: {}]   ;;  %s305_s2 = inlined_call_operand.vmem [shape: f32[2,128], index: 2, kind: input, shape index: {}]   ;;  %s306_s3 = inlined_call_operand.hbm [shape: f32[2,16,128], index: 3, kind: output, shape index: {}]  }
   0x1   :  { %9 = vsyncpa [#allocation7], 0 }
   0x2   :  { %10 = vsyncpa [#allocation5], 0  ;;  %s232_s12 = smov [#allocation3]   ;;  %s160_s16 = scalar_lea.hbm %s303_s0, 512 }
   0x3   :  { %s16_s13 = sshll.u32 %s232_s12, 4  ;;  %p161_p0 = scmp.ne.s32.totalorder %s303_s0, %s160_s16  ;;  %s17_s13 = int_to_ptr.vmem [resolvable:$true] %s16_s13 }
   0x4   :  { %p164_p1 = scmp.lt.u32.totalorder %s160_s16, %s303_s0 }
   0x6   :  { %p166_p2 = pnand %p164_p1, %p161_p0 }
   0x8   :  { %169 = shalt.err (!%p166_p2)
}
   0x9   :  { %s170_s21 = scalar_lea.vmem %s17_s13, 512  ;;  %p175_p4 = scmp.lt.s32.totalorder %s17_s13, %s17_s13 }
   0xa   :  { %p171_p3 = scmp.ne.s32.totalorder %s17_s13, %s170_s21  ;;  %p176_p5 = scmp.lt.s32.totalorder %s170_s21, %s170_s21 }
   0xc   :  { %p177_p6 = por %p176_p5, %p175_p4 }
   0xe   :  { %p178_p7 = pnand %p177_p6, %p171_p3 }
  0x10   :  { %181 = shalt.err (!%p178_p7)
}
  0x11   :  { %s233_s22 = smov 128   ;;  %s234_s23 = smov 8  }
  0x12   :  { %22 = dma.hbm_to_vmem [thread:$0]  %s303_s0, 512, %s17_s13, [#allocation4], %s233_s22, %s233_s22, %s234_s23  }
  0x13   :  { %s235_s26 = smov [#allocation6]   ;;  %s182_s30 = scalar_lea.hbm %s304_s1, 64 }
  0x14   :  { %s29_s27 = sshll.u32 %s235_s26, 4  ;;  %p183_p8 = scmp.ne.s32.totalorder %s304_s1, %s182_s30  ;;  %s30_s27 = int_to_ptr.vmem [resolvable:$true] %s29_s27 }
  0x15   :  { %p186_p9 = scmp.lt.u32.totalorder %s182_s30, %s304_s1 }
  0x17   :  { %p188_p10 = pnand %p186_p9, %p183_p8 }
  0x19   :  { %191 = shalt.err (!%p188_p10)
}
  0x1a   :  { %s192_s8 = scalar_lea.vmem %s30_s27, 64  ;;  %p197_p12 = scmp.lt.s32.totalorder %s30_s27, %s30_s27 }
  0x1b   :  { %p193_p11 = scmp.ne.s32.totalorder %s30_s27, %s192_s8  ;;  %p198_p13 = scmp.lt.s32.totalorder %s192_s8, %s192_s8 }
  0x1d   :  { %p199_p0 = por %p198_p13, %p197_p12 }
  0x1f   :  { %p200_p1 = pnand %p199_p0, %p193_p11 }
  0x21   :  { %203 = shalt.err (!%p200_p1)
}
  0x22   :  { %32 = dma.hbm_to_vmem [thread:$0]  %s304_s1, 64, %s30_s27, [#allocation7]  }
  0x23   :  { %226 = dma.done.wait [#allocation4], 512  }
  0x24   :  { %227 = vsyncadd [#allocation4], 4294966784 }
  0x25   :  { %228 = dma.done.wait [#allocation7], 64  }
  0x26   :  { %229 = vsyncadd [#allocation7], 4294967232  ;;  %v59_v0 = vlaneseq  ;;  %v236_v1 = vmov 0.0   ;;  %v46_v3 = vld [vmem:[#allocation3] sm:$0xff]  ;;  %v47_v4 = vld [vmem:[#allocation3 + $0x8] sm:$0xff] }
  0x27   :  { %42 = vst [vmem:[#allocation2] sm:$0x3] %v236_v1  ;;  %43 = vst [vmem:[#allocation2 + $0x18] sm:$0x3] %v236_v1  ;;  %v48_v5 = vld [vmem:[#allocation3 + $0x10] sm:$0xff]  ;;  %v49_v7 = vld [vmem:[#allocation3 + $0x18] sm:$0xff] }
  0x28   :  { %44 = vst [vmem:[#allocation2 + $0x12] sm:$0x3] %v236_v1  ;;  %45 = vst [vmem:[#allocation2 + $0x2a] sm:$0x3] %v236_v1  ;;  %v60_v2 = vshrl.u32 %v59_v0, 7 }
  0x29   :  { %50 = vst [vmem:[#allocation2 + $0x2] sm:$0xff] %v46_v3  ;;  %51 = vst [vmem:[#allocation2 + $0xa] sm:$0xff] %v47_v4  ;;  %v41_v8 = vld [vmem:[#allocation6] sm:$0x7]  ;;  %v99_v14 = vld [vmem:[%s305_s2] sm:$0x3] }
  0x2a   :  { %v61_v6 = vsub.s32 2, %v60_v2  ;;  %52 = vst [vmem:[#allocation2 + $0x1a] sm:$0xff] %v48_v5  ;;  %v73_v9 = vsub.s32 0, %v60_v2  ;;  %53 = vst [vmem:[#allocation2 + $0x22] sm:$0xff] %v49_v7  ;;  %v58_v10 = vadd.f32 1.0, %v41_v8  ;;  %v89_v11 = vsub.s32 1, %v60_v2 }
  0x2b   :  { %s237_s2 = smov [#allocation8]  }
  0x2c   :  { %v62_v12 = vrot.slane %v58_v10, %v61_v6  ;;  %v74_v13 = vrot.slane %v41_v8, %v73_v9  ;;  %v90_v16 = vrot.slane %v41_v8, %v89_v11  ;;  %v107_v19 = vrot.slane %v99_v14, %v73_v9  ;;  %s141_s11 = sshll.u32 %s237_s2, 4  ;;  %s142_s11 = int_to_ptr.vmem [resolvable:$true] %s141_s11 }
  0x2d   :  { %v123_v27 = vrot.slane %v99_v14, %v89_v11  ;;  %s204_s12 = scalar_lea.vmem %s142_s11, 512  ;;  %p209_p3 = scmp.lt.s32.totalorder %s142_s11, %s142_s11 }
  0x2e   :  { %v63_v15 = vmul.f32 %v62_v12, %v46_v3  ;;  %v64_v20 = vmul.f32 %v62_v12, %v47_v4  ;;  %v65_v25 = vmul.f32 %v62_v12, %v48_v5  ;;  %v66_v36 = vmul.f32 %v62_v12, %v49_v7  ;;  %p205_p2 = scmp.ne.s32.totalorder %s142_s11, %s204_s12  ;;  %p210_p4 = scmp.lt.s32.totalorder %s204_s12, %s204_s12 }
  0x30   :  { %v67_v17 = vld [vmem:[#allocation2] sm:$0xff]  ;;  %v68_v23 = vld [vmem:[#allocation2 + $0x8] sm:$0xff]  ;;  %p211_p5 = por %p210_p4, %p209_p3 }
  0x31   :  { %v83_v18 = vld [vmem:[#allocation2 + $0x1] sm:$0xff]  ;;  %v75_v21 = vmul.f32 %v74_v13, %v67_v17  ;;  %v84_v24 = vld [vmem:[#allocation2 + $0x9] sm:$0xff]  ;;  %v76_v28 = vmul.f32 %v74_v13, %v68_v23  ;;  %v69_v29 = vld [vmem:[#allocation2 + $0x18] sm:$0xff] }
  0x32   :  { %v100_v22 = vld [vmem:[#allocation2 + $0x3] sm:$0xff]  ;;  %v91_v31 = vmul.f32 %v90_v16, %v83_v18  ;;  %v101_v32 = vld [vmem:[#allocation2 + $0xb] sm:$0xff]  ;;  %v77_v33 = vmul.f32 %v74_v13, %v69_v29  ;;  %v85_v34 = vld [vmem:[#allocation2 + $0x19] sm:$0xff]  ;;  %v92_v39 = vmul.f32 %v90_v16, %v84_v24  ;;  %p212_p6 = pnand %p211_p5, %p205_p2 }
  0x33   :  { %v116_v26 = vld [vmem:[#allocation2 + $0x4] sm:$0xff]  ;;  %v79_v30 = vadd.f32 %v75_v21, %v63_v15  ;;  %v102_v35 = vld [vmem:[#allocation2 + $0x1b] sm:$0xff]  ;;  %v108_v37 = vmul.f32 %v107_v19, %v100_v22  ;;  %v80_v38 = vadd.f32 %v76_v28, %v64_v20  ;;  %v117_v43 = vld [vmem:[#allocation2 + $0xc] sm:$0xff]  ;;  %v93_v45 = vmul.f32 %v90_v16, %v85_v34 }
  0x34   :  { %v70_v40 = vld [vmem:[#allocation2 + $0x20] sm:$0xff]  ;;  %v81_v44 = vadd.f32 %v77_v33, %v65_v25  ;;  %v124_v48 = vmul.f32 %v123_v27, %v116_v26  ;;  %v109_v50 = vmul.f32 %v107_v19, %v101_v32  ;;  %v110_v51 = vmul.f32 %v107_v19, %v102_v35 }
  0x35   :  { %v86_v41 = vld [vmem:[#allocation2 + $0x21] sm:$0xff]  ;;  %v95_v42 = vadd.f32 %v91_v31, %v79_v30  ;;  %v78_v47 = vmul.f32 %v74_v13, %v70_v40  ;;  %v96_v49 = vadd.f32 %v92_v39, %v80_v38  ;;  %v125_v58 = vmul.f32 %v123_v27, %v117_v43 }
  0x36   :  { %v118_v46 = vld [vmem:[#allocation2 + $0x1c] sm:$0xff]  ;;  %v97_v54 = vadd.f32 %v93_v45, %v81_v44  ;;  %v94_v56 = vmul.f32 %v90_v16, %v86_v41  ;;  %v119_v60 = vld [vmem:[#allocation2 + $0x24] sm:$0xff] }
  0x37   :  { %v103_v52 = vld [vmem:[#allocation2 + $0x23] sm:$0xff]  ;;  %v112_v53 = vadd.f32 %v108_v37, %v95_v42  ;;  %v82_v55 = vadd.f32 %v78_v47, %v66_v36  ;;  %v113_v57 = vadd.f32 %v109_v50, %v96_v49  ;;  %v126_v59 = vmul.f32 %v123_v27, %v118_v46 }
  0x38   :  { %v114_v62 = vadd.f32 %v110_v51, %v97_v54  ;;  %v111_v0 = vmul.f32 %v107_v19, %v103_v52  ;;  %v127_v4 = vmul.f32 %v123_v27, %v119_v60 }
  0x39   :  { %v128_v61 = vadd.f32 %v124_v48, %v112_v53  ;;  %v98_v63 = vadd.f32 %v94_v56, %v82_v55  ;;  %v129_v1 = vadd.f32 %v125_v58, %v113_v57 }
  0x3a   :  { %v130_v2 = vadd.f32 %v126_v59, %v114_v62 }
  0x3b   :  { %132 = vst [vmem:[#allocation8] sm:$0xff] %v128_v61  ;;  %v115_v3 = vadd.f32 %v111_v0, %v98_v63  ;;  %133 = vst [vmem:[#allocation8 + $0x8] sm:$0xff] %v129_v1 }
  0x3c   :  { %134 = vst [vmem:[#allocation8 + $0x10] sm:$0xff] %v130_v2 }
  0x3d   :  { %v131_v5 = vadd.f32 %v127_v4, %v115_v3 }
  0x3f   :  { %135 = vst [vmem:[#allocation8 + $0x18] sm:$0xff] %v131_v5 }
  0x40   :  { %215 = shalt.err (!%p212_p6)
}
  0x41   :  { %s216_s15 = scalar_lea.hbm %s306_s3, 512 }
  0x42   :  { %p217_p7 = scmp.ne.s32.totalorder %s306_s3, %s216_s15  ;;  %p220_p8 = scmp.lt.u32.totalorder %s216_s15, %s306_s3 }
  0x44   :  { %p222_p9 = pnand %p220_p8, %p217_p7 }
  0x46   :  { %225 = shalt.err (!%p222_p9)
}
  0x47   :  { %147 = dma.vmem_to_hbm [thread:$0]  %s142_s11, 512, %s306_s3, [#allocation5], %s233_s22, %s233_s22, %s234_s23  }
  0x48   :  { %230 = dma.done.wait [#allocation5], 512  }
  0x49   :  { %231 = vsyncadd [#allocation5], 4294966784 }
  0x4a   :  { %151 = vsyncpa [#allocation4], 1 }
  0x4b   :  { %152 = vsyncpa [#allocation7], 1 }
  0x4c   :  { %153 = vsyncpa [#allocation5], 1 }

</bundles_post_ra>
